<compile_context>
chip_gen: v7x
topology: tpu7x:2x2x1
jax: 0.10.0
libtpu: 0.0.40
codegen_flags: <defaults>
</compile_context>

<pallas_src>
import jax
import jax.numpy as jnp
from jax.experimental import pallas as pl
from jax.experimental.pallas import tpu as pltpu

STATE_DIM = 4          # CartPole observation dim
ACTION_DIM = 2         # CartPole action dim
HIDDEN = 64
FUSED_H = 2 * HIDDEN   # actor hidden | critic hidden, lane-packed -> 128

# Packed-weight row layout (second-to-last dim of the weight slab).
_L1_OFF = 0                      # rows 0:4   -> fused layer-1 weight (4, 128)
_L2_OFF = 8                      # rows 8:136 -> block-diag layer-2   (128, 128)
_L3_OFF = _L2_OFF + FUSED_H      # rows 136:264 -> layer-3            (128, 128)
_W_ROWS = _L3_OFF + FUSED_H      # 264

# Output lane layout of the single (B, 128) result slab.
OUT_LANES = 128
_P0, _P1 = 0, ACTION_DIM                       # probs      lanes [0, 2)
_L0, _L1 = ACTION_DIM, 2 * ACTION_DIM          # log-probs  lanes [2, 4)
_V = 2 * ACTION_DIM                            # value      lane 4
_E = 2 * ACTION_DIM + 1                        # entropy    lane 5


def _actor_critic_kernel(x_ref, w_ref, b_ref, out_ref):
    x = x_ref[...]                                   # (Bb, 4) f32

    # Static slices of the packed parameter slabs (views into VMEM).
    w1 = w_ref[_L1_OFF:_L1_OFF + STATE_DIM, :]       # (4, 128)
    w2 = w_ref[_L2_OFF:_L2_OFF + FUSED_H, :]         # (128, 128) block-diagonal
    w3 = w_ref[_L3_OFF:_L3_OFF + FUSED_H, :]         # (128, 128)
    b1 = b_ref[0:1, :]                               # (1, 128)
    b2 = b_ref[1:2, :]
    b3 = b_ref[2:3, :]

    # Fused actor/critic MLP: 3 lane-dense matmuls, tanh on all 128 lanes.
    h = jnp.tanh(jnp.dot(x, w1, preferred_element_type=jnp.float32) + b1)
    h = jnp.tanh(jnp.dot(h, w2, preferred_element_type=jnp.float32) + b2)
    y = jnp.dot(h, w3, preferred_element_type=jnp.float32) + b3   # (Bb, 128)

    logits = y[:, 0:ACTION_DIM]                      # actor head
    value = y[:, ACTION_DIM:ACTION_DIM + 1]          # critic head

    # Numerically-stable softmax / log-softmax / entropy (all in-kernel).
    m = jnp.max(logits, axis=-1, keepdims=True)
    z = logits - m
    e = jnp.exp(z)
    s = jnp.sum(e, axis=-1, keepdims=True)
    probs = e * pl.reciprocal(s, approx=True)        # EUP vrcp
    logp = z - jnp.log(s)                            # stable log-probs
    entropy = -jnp.sum(probs * logp, axis=-1, keepdims=True)

    # One lane-dense output slab; single dense writeback DMA.
    out_ref[...] = jnp.zeros_like(out_ref)
    out_ref[:, _P0:_P1] = probs
    out_ref[:, _L0:_L1] = logp
    out_ref[:, _V:_V + 1] = value
    out_ref[:, _E:_E + 1] = entropy


def actor_critic_pallas(state, w_all, b_all, *, block_b=None):
    """Runs the fused kernel.

    Returns a (B, 128) f32 slab: lanes 0:2 = probs, 2:4 = log-probs,
    lane 4 = state value, lane 5 = entropy.
    """
    B = state.shape[0]
    out_shape = jax.ShapeDtypeStruct((B, OUT_LANES), jnp.float32)

    if block_b is None or block_b >= B:
        # Small-batch act() hot path: grid-less, everything in one VMEM block.
        vmem = pl.BlockSpec(memory_space=pltpu.MemorySpace.VMEM)
        return pl.pallas_call(
            _actor_critic_kernel,
            out_shape=out_shape,
            in_specs=[vmem, vmem, vmem],
            out_specs=vmem,
        )(state, w_all, b_all)

    # Large-batch evaluate() path: 1-D parallel grid over the batch
    # (shards across both TensorCores on v7x; harmless on v5e/v6e).
    assert B % block_b == 0 and block_b % 8 == 0
    return pl.pallas_call(
        _actor_critic_kernel,
        out_shape=out_shape,
        grid=(B // block_b,),
        in_specs=[
            pl.BlockSpec((block_b, STATE_DIM), lambda i: (i, 0)),
            pl.BlockSpec((_W_ROWS, OUT_LANES), lambda i: (0, 0)),
            pl.BlockSpec((3, OUT_LANES), lambda i: (0, 0)),
        ],
        out_specs=pl.BlockSpec((block_b, OUT_LANES), lambda i: (i, 0)),
        compiler_params=pltpu.CompilerParams(
            dimension_semantics=("parallel",)),
    )(state, w_all, b_all)


# --------------------------------------------------------------------------
# Parameter construction / packing (done once, outside the hot path).
# --------------------------------------------------------------------------
def init_params(key):
    """Deterministic per-layer params (same shapes as the PyTorch module,
    weights stored transposed as (in, out), biases as (1, out))."""
    ks = jax.random.split(key, 12)

    def lin(kw, kb, fan_in, fan_out):
        bound = 1.0 / jnp.sqrt(fan_in)
        w = jax.random.uniform(kw, (fan_in, fan_out), jnp.float32, -bound, bound)
        b = jax.random.uniform(kb, (1, fan_out), jnp.float32, -bound, bound)
        return w, b

    aw1, ab1 = lin(ks[0], ks[1], STATE_DIM, HIDDEN)
    aw2, ab2 = lin(ks[2], ks[3], HIDDEN, HIDDEN)
    aw3, ab3 = lin(ks[4], ks[5], HIDDEN, ACTION_DIM)
    cw1, cb1 = lin(ks[6], ks[7], STATE_DIM, HIDDEN)
    cw2, cb2 = lin(ks[8], ks[9], HIDDEN, HIDDEN)
    cw3, cb3 = lin(ks[10], ks[11], HIDDEN, 1)
    return dict(aw1=aw1, ab1=ab1, aw2=aw2, ab2=ab2, aw3=aw3, ab3=ab3,
                cw1=cw1, cb1=cb1, cw2=cw2, cb2=cb2, cw3=cw3, cb3=cb3)


def pack_params(p):
    """Pack the 12 tensors into one (264,128) weight slab + one (3,128) bias slab."""
    w = jnp.zeros((_W_ROWS, OUT_LANES), jnp.float32)
    # layer 1: [aw1 | cw1] in rows 0:4 (rows 4:8 are unused padding)
    w = w.at[_L1_OFF:_L1_OFF + STATE_DIM, 0:HIDDEN].set(p["aw1"])
    w = w.at[_L1_OFF:_L1_OFF + STATE_DIM, HIDDEN:FUSED_H].set(p["cw1"])
    # layer 2: block-diagonal [[aw2, 0], [0, cw2]]
    w = w.at[_L2_OFF:_L2_OFF + HIDDEN, 0:HIDDEN].set(p["aw2"])
    w = w.at[_L2_OFF + HIDDEN:_L2_OFF + FUSED_H, HIDDEN:FUSED_H].set(p["cw2"])
    # layer 3: cols 0:2 <- actor logits head, col 2 <- critic value head
    w = w.at[_L3_OFF:_L3_OFF + HIDDEN, 0:ACTION_DIM].set(p["aw3"])
    w = w.at[_L3_OFF + HIDDEN:_L3_OFF + FUSED_H,
             ACTION_DIM:ACTION_DIM + 1].set(p["cw3"])

    b = jnp.zeros((3, OUT_LANES), jnp.float32)
    b = b.at[0, 0:HIDDEN].set(p["ab1"][0])
    b = b.at[0, HIDDEN:FUSED_H].set(p["cb1"][0])
    b = b.at[1, 0:HIDDEN].set(p["ab2"][0])
    b = b.at[1, HIDDEN:FUSED_H].set(p["cb2"][0])
    b = b.at[2, 0:ACTION_DIM].set(p["ab3"][0])
    b = b.at[2, ACTION_DIM:ACTION_DIM + 1].set(p["cb3"][0])
    return w, b


# --------------------------------------------------------------------------
# PyTorch-module mirrors (sampling / .item() stay in JAX glue).
# --------------------------------------------------------------------------
def act(state, w_all, b_all, key):
    """Mirror of ActorCritic.act(): sample action + log-prob."""
    out = actor_critic_pallas(state, w_all, b_all)
    logp = out[:, _L0:_L1]
    action = jax.random.categorical(key, logp, axis=-1)      # dist.sample()
    action_logprob = jnp.take_along_axis(logp, action[:, None], axis=-1)[:, 0]
    return action, action_logprob


def evaluate(state, action, w_all, b_all, *, block_b=None):
    """Mirror of ActorCritic.evaluate()."""
    out = actor_critic_pallas(state, w_all, b_all, block_b=block_b)
    logp = out[:, _L0:_L1]
    action_logprobs = jnp.take_along_axis(
        logp, action[:, None].astype(jnp.int32), axis=-1)[:, 0]
    state_values = out[:, _V:_V + 1]
    entropy = out[:, _E]
    return action_logprobs, state_values, entropy


def reference_forward(state, p):
    """Pure-JAX reference of the PyTorch forward math (for correctness checks)."""
    a = jnp.tanh(state @ p["aw1"] + p["ab1"])
    a = jnp.tanh(a @ p["aw2"] + p["ab2"])
    logits = a @ p["aw3"] + p["ab3"]
    probs = jax.nn.softmax(logits, axis=-1)
    logp = jax.nn.log_softmax(logits, axis=-1)
    entropy = -jnp.sum(probs * logp, axis=-1)
    c = jnp.tanh(state @ p["cw1"] + p["cb1"])
    c = jnp.tanh(c @ p["cw2"] + p["cb2"])
    value = c @ p["cw3"] + p["cb3"]
    return probs, logp, value, entropy


if __name__ == "__main__":
    key = jax.random.PRNGKey(0)
    k_param, k_state, k_sample, k_state2, k_act2 = jax.random.split(key, 5)

    params = init_params(k_param)
    w_all, b_all = pack_params(params)      # one-time packing

    # ---------- small-batch act() hot path (grid-less) ----------
    B = 8
    state = jax.random.normal(k_state, (B, STATE_DIM), jnp.float32)

    out = actor_critic_pallas(state, w_all, b_all)
    jax.block_until_ready(out)
    probs, logp = out[:, _P0:_P1], out[:, _L0:_L1]
    value, entropy = out[:, _V:_V + 1], out[:, _E]

    r_probs, r_logp, r_value, r_entropy = reference_forward(state, params)
    assert jnp.allclose(probs, r_probs, atol=5e-3), "probs mismatch"
    assert jnp.allclose(logp, r_logp, atol=5e-3), "log-prob mismatch"
    assert jnp.allclose(value, r_value, atol=5e-3), "value mismatch"
    assert jnp.allclose(entropy, r_entropy, atol=5e-3), "entropy mismatch"
    # approx reciprocal -> rows sum to 1 only to ~1e-3
    assert jnp.allclose(jnp.sum(probs, axis=-1), 1.0, atol=5e-3)

    actions, logps = act(state, w_all, b_all, k_sample)
    lp, v, ent = evaluate(state, actions, w_all, b_all)
    jax.block_until_ready((actions, logps, lp, v, ent))
    assert v.shape == (B, 1) and lp.shape == (B,) and ent.shape == (B,)

    # ---------- larger-batch evaluate() path (1-D parallel batch grid) ----------
    B2, blk = 64, 32
    state2 = jax.random.normal(k_state2, (B2, STATE_DIM), jnp.float32)
    actions2 = jax.random.randint(k_act2, (B2,), 0, ACTION_DIM)
    lp2, v2, ent2 = evaluate(state2, actions2, w_all, b_all, block_b=blk)
    jax.block_until_ready((lp2, v2, ent2))

    _, r_logp2, r_value2, r_entropy2 = reference_forward(state2, params)
    r_lp2 = jnp.take_along_axis(r_logp2, actions2[:, None], axis=-1)[:, 0]
    assert jnp.allclose(lp2, r_lp2, atol=5e-3), "batched log-prob mismatch"
    assert jnp.allclose(v2, r_value2, atol=5e-3), "batched value mismatch"
    assert jnp.allclose(ent2, r_entropy2, atol=5e-3), "batched entropy mismatch"

    print("KERNEL_OK")
</pallas_src>

<mosaic_0001>
module attributes {stable_mosaic.version = 11 : i64} {
  func.func @_actor_critic_kernel(%arg0: memref<8x4xf32, #tpu.memory_space<vmem>>, %arg1: memref<264x128xf32, #tpu.memory_space<vmem>>, %arg2: memref<3x128xf32, #tpu.memory_space<vmem>>, %arg3: memref<8x128xf32, #tpu.memory_space<vmem>>) attributes {dimension_semantics = [], scalar_prefetch = 0 : i64, scratch_operands = 0 : i64, tpu.core_type = #tpu.core_type<tc>} {
    %c0 = arith.constant 0 : index
    %c0_0 = arith.constant 0 : index
    %0 = vector.load %arg0[%c0, %c0_0] : memref<8x4xf32, #tpu.memory_space<vmem>>, vector<8x4xf32>
    %c0_1 = arith.constant 0 : index
    %c0_2 = arith.constant 0 : index
    %1 = vector.load %arg1[%c0_1, %c0_2] : memref<264x128xf32, #tpu.memory_space<vmem>>, vector<4x128xf32>
    %c8 = arith.constant 8 : index
    %c0_3 = arith.constant 0 : index
    %2 = vector.load %arg1[%c8, %c0_3] : memref<264x128xf32, #tpu.memory_space<vmem>>, vector<128x128xf32>
    %c136 = arith.constant 136 : index
    %c0_4 = arith.constant 0 : index
    %3 = vector.load %arg1[%c136, %c0_4] : memref<264x128xf32, #tpu.memory_space<vmem>>, vector<128x128xf32>
    %c0_5 = arith.constant 0 : index
    %c0_6 = arith.constant 0 : index
    %4 = vector.load %arg2[%c0_5, %c0_6] : memref<3x128xf32, #tpu.memory_space<vmem>>, vector<1x128xf32>
    %c1 = arith.constant 1 : index
    %c0_7 = arith.constant 0 : index
    %5 = vector.load %arg2[%c1, %c0_7] : memref<3x128xf32, #tpu.memory_space<vmem>>, vector<1x128xf32>
    %c2 = arith.constant 2 : index
    %c0_8 = arith.constant 0 : index
    %6 = vector.load %arg2[%c2, %c0_8] : memref<3x128xf32, #tpu.memory_space<vmem>>, vector<1x128xf32>
    %cst = arith.constant dense<0.000000e+00> : vector<8x128xf32>
    %7 = tpu.matmul %0, %1, %cst {dimension_numbers = #tpu.dot_dimension_numbers<[1], [0], [0], [1], [0, 0, 1, 1], [], []>} : vector<8x4xf32>, vector<4x128xf32>, vector<8x128xf32> -> vector<8x128xf32>
    %8 = vector.broadcast %4 : vector<1x128xf32> to vector<8x128xf32>
    %9 = arith.addf %7, %8 : vector<8x128xf32>
    %10 = math.tanh %9 : vector<8x128xf32>
    %cst_9 = arith.constant dense<0.000000e+00> : vector<8x128xf32>
    %11 = tpu.matmul %10, %2, %cst_9 {dimension_numbers = #tpu.dot_dimension_numbers<[1], [0], [0], [1], [0, 0, 1, 1], [], []>} : vector<8x128xf32>, vector<128x128xf32>, vector<8x128xf32> -> vector<8x128xf32>
    %12 = vector.broadcast %5 : vector<1x128xf32> to vector<8x128xf32>
    %13 = arith.addf %11, %12 : vector<8x128xf32>
    %14 = math.tanh %13 : vector<8x128xf32>
    %cst_10 = arith.constant dense<0.000000e+00> : vector<8x128xf32>
    %15 = tpu.matmul %14, %3, %cst_10 {dimension_numbers = #tpu.dot_dimension_numbers<[1], [0], [0], [1], [0, 0, 1, 1], [], []>} : vector<8x128xf32>, vector<128x128xf32>, vector<8x128xf32> -> vector<8x128xf32>
    %16 = vector.broadcast %6 : vector<1x128xf32> to vector<8x128xf32>
    %17 = arith.addf %15, %16 : vector<8x128xf32>
    %18 = vector.extract_strided_slice %17 {offsets = [0, 0], sizes = [8, 2], strides = [1, 1]} : vector<8x128xf32> to vector<8x2xf32>
    %19 = vector.extract_strided_slice %17 {offsets = [0, 2], sizes = [8, 1], strides = [1, 1]} : vector<8x128xf32> to vector<8x1xf32>
    %cst_11 = arith.constant dense<0xFF800000> : vector<8xf32>
    %20 = vector.multi_reduction <maximumf>, %18, %cst_11 [1] : vector<8x2xf32> to vector<8xf32>
    %21 = vector.shape_cast %20 : vector<8xf32> to vector<8x1xf32>
    %22 = vector.broadcast %21 : vector<8x1xf32> to vector<8x2xf32>
    %23 = arith.subf %18, %22 : vector<8x2xf32>
    %24 = math.exp %23 : vector<8x2xf32>
    %cst_12 = arith.constant dense<0.000000e+00> : vector<8xf32>
    %25 = vector.multi_reduction <add>, %24, %cst_12 [1] : vector<8x2xf32> to vector<8xf32>
    %26 = vector.shape_cast %25 : vector<8xf32> to vector<8x1xf32>
    %27 = tpu.reciprocal %26 {approx = true} : vector<8x1xf32> -> vector<8x1xf32>
    %28 = vector.broadcast %27 : vector<8x1xf32> to vector<8x2xf32>
    %29 = arith.mulf %24, %28 : vector<8x2xf32>
    %30 = math.log %26 : vector<8x1xf32>
    %31 = vector.broadcast %30 : vector<8x1xf32> to vector<8x2xf32>
    %32 = arith.subf %23, %31 : vector<8x2xf32>
    %33 = arith.mulf %29, %32 : vector<8x2xf32>
    %cst_13 = arith.constant dense<0.000000e+00> : vector<8xf32>
    %34 = vector.multi_reduction <add>, %33, %cst_13 [1] : vector<8x2xf32> to vector<8xf32>
    %35 = vector.shape_cast %34 : vector<8xf32> to vector<8x1xf32>
    %cst_14 = arith.constant 0.000000e+00 : f32
    %36 = vector.broadcast %cst_14 : f32 to vector<8x1xf32>
    %37 = arith.subf %36, %35 : vector<8x1xf32>
    %cst_15 = arith.constant 0.000000e+00 : f32
    %38 = vector.broadcast %cst_15 : f32 to vector<8x128xf32>
    %c0_16 = arith.constant 0 : index
    %c0_17 = arith.constant 0 : index
    %39 = vector.load %arg3[%c0_16, %c0_17] : memref<8x128xf32, #tpu.memory_space<vmem>>, vector<8x128xf32>
    tpu.vector_store %arg3[%c0_16, %c0_17], %38 {strides = array<i32>} : memref<8x128xf32, #tpu.memory_space<vmem>>, vector<8x128xf32>,
    %c0_18 = arith.constant 0 : index
    %c0_19 = arith.constant 0 : index
    %40 = vector.load %arg3[%c0_18, %c0_19] : memref<8x128xf32, #tpu.memory_space<vmem>>, vector<8x2xf32>
    tpu.vector_store %arg3[%c0_18, %c0_19], %29 {strides = array<i32>} : memref<8x128xf32, #tpu.memory_space<vmem>>, vector<8x2xf32>,
    %c0_20 = arith.constant 0 : index
    %c2_21 = arith.constant 2 : index
    %41 = vector.load %arg3[%c0_20, %c2_21] : memref<8x128xf32, #tpu.memory_space<vmem>>, vector<8x2xf32>
    tpu.vector_store %arg3[%c0_20, %c2_21], %32 {strides = array<i32>} : memref<8x128xf32, #tpu.memory_space<vmem>>, vector<8x2xf32>,
    %c0_22 = arith.constant 0 : index
    %c4 = arith.constant 4 : index
    %42 = vector.load %arg3[%c0_22, %c4] : memref<8x128xf32, #tpu.memory_space<vmem>>, vector<8x1xf32>
    tpu.vector_store %arg3[%c0_22, %c4], %19 {strides = array<i32>} : memref<8x128xf32, #tpu.memory_space<vmem>>, vector<8x1xf32>,
    %c0_23 = arith.constant 0 : index
    %c5 = arith.constant 5 : index
    %43 = vector.load %arg3[%c0_23, %c5] : memref<8x128xf32, #tpu.memory_space<vmem>>, vector<8x1xf32>
    tpu.vector_store %arg3[%c0_23, %c5], %37 {strides = array<i32>} : memref<8x128xf32, #tpu.memory_space<vmem>>, vector<8x1xf32>,
    return
  }
}

</mosaic_0001>

<bundles_post_ra>
// kernel: tpu_custom_call.1
= control target key start
LH: loop header
LB: loop body
LE: loop exit
PB: predicated region body
PF: predicated region fallthrough
CT: control target
= control target key end

     0   :  { %8 = vsyncpa [#allocation3], 0  ;;  %s666_s0 = inlined_call_operand.vmem [shape: f32[8,4], index: 0, kind: input, shape index: {}]   ;;  %s667_s1 = inlined_call_operand.hbm [shape: f32[264,128], index: 1, kind: input, shape index: {}]   ;;  %s668_s2 = inlined_call_operand.vmem [shape: f32[3,128], index: 2, kind: input, shape index: {}]   ;;  %s669_s3 = inlined_call_operand.hbm [shape: f32[8,128], index: 3, kind: output, shape index: {}]  }
   0x1   :  { %9 = vsyncpa [#allocation4], 0  ;;  %s579_s12 = smov [#allocation2]   ;;  %s531_s16 = scalar_lea.hbm %s667_s1, 4224 }
   0x2   :  { %s17_s13 = sshll.u32 %s579_s12, 4  ;;  %p532_p0 = scmp.ne.s32.totalorder %s667_s1, %s531_s16  ;;  %s18_s13 = int_to_ptr.vmem [resolvable:$true] %s17_s13 }
   0x3   :  { %p535_p1 = scmp.lt.u32.totalorder %s531_s16, %s667_s1 }
   0x5   :  { %p537_p2 = pnand %p535_p1, %p532_p0 }
   0x7   :  { %540 = shalt.err (!%p537_p2)
}
   0x8   :  { %s541_s21 = scalar_lea.vmem %s18_s13, 4224  ;;  %p546_p4 = scmp.lt.s32.totalorder %s18_s13, %s18_s13 }
   0x9   :  { %p542_p3 = scmp.ne.s32.totalorder %s18_s13, %s541_s21  ;;  %p547_p5 = scmp.lt.s32.totalorder %s541_s21, %s541_s21 }
   0xb   :  { %p548_p6 = por %p547_p5, %p546_p4 }
   0xd   :  { %p549_p7 = pnand %p548_p6, %p542_p3 }
   0xf   :  { %552 = shalt.err (!%p549_p7)
}
  0x10   :  { %s580_s22 = smov 128   ;;  %s581_s23 = smov 8  }
  0x11   :  { %23 = dma.hbm_to_vmem [thread:$0]  %s667_s1, 4224, %s18_s13, [#allocation3], %s580_s22, %s580_s22, %s581_s23  }
  0x12   :  { %575 = dma.done.wait [#allocation3], 4224  }
  0x13   :  { %576 = vsyncadd [#allocation3], 4294963072  ;;  %v582_v0 = vmov 0.0   ;;  %vm583_vm0 = vmmov 0   ;;  %v584_v1 = vmov 0.0|0.0   ;;  %vm74_vm1 = vcmask 1043456  }
  0x14   :  { %390 = vmatprep.subr.mxu0 %v582_v0  ;;  %318 = vst [vmem:[#allocation5] sm:$0xff] %v582_v0  ;;  %392 = vmatprep.mubr.msk.f32.mxu0 %vm583_vm0, %v582_v0  ;;  %vm70_vm2 = vcmask 31744   ;;  %v30_v2 = vld [vmem:[#allocation2] sm:$0xf]  ;;  %v29_v3 = vld [vmem:[%s666_s0] sm:$0xff]  ;;  %v31_v4 = vld [vmem:[#allocation2 + $0x8] sm:$0xff] }
  0x15   :  { %465 = vmatprep.subr.bf16.mxu1 %v584_v1  ;;  %427 = vmatprep.mubr.msk.f32.mxu1 %vm583_vm0, %v582_v0  ;;  %v32_v5 = vld [vmem:[#allocation2 + $0x10] sm:$0xff]  ;;  %v33_v6 = vld [vmem:[#allocation2 + $0x18] sm:$0xff]  ;;  %v34_v7 = vld [vmem:[#allocation2 + $0x20] sm:$0xff]  ;;  %vm298_vm3 = vcmask 15360   ;;  %s585_s5 = smov 2   ;;  %vm324_vm4 = vcmask 31760  }
  0x16   :  { %391 = vmatpush3.msk.msra.mxu0 %vm74_vm1, %v30_v2  ;;  %v466_v8 = vpack.c.bf16 %v32_v5, %v31_v4  ;;  %v469_v9 = vpack.c.bf16 %v34_v7, %v33_v6  ;;  %v35_v10 = vld [vmem:[#allocation2 + $0x28] sm:$0xff]  ;;  %v36_v11 = vld [vmem:[#allocation2 + $0x30] sm:$0xff]  ;;  %v37_v13 = vld [vmem:[#allocation2 + $0x38] sm:$0xff]  ;;  %vm330_vm5 = vcmask 39968   ;;  %vm332_vm6 = vcmask 48168  }
  0x17   :  { %393 = vmatmul.mubr.msk.f32.vlgmr.msra.gmra.mrb[0].mxu0 %vm70_vm2, %v29_v3  ;;  %489 = vmatprep.subr.bf16.mxu0 %v584_v1  ;;  %v472_v12 = vpack.c.bf16 %v36_v11, %v35_v10  ;;  %v38_v14 = vld [vmem:[#allocation2 + $0x40] sm:$0xff]  ;;  %v39_v16 = vld [vmem:[#allocation2 + $0x48] sm:$0xff]  ;;  %v40_v17 = vld [vmem:[#allocation2 + $0x50] sm:$0xff] }
  0x18   :  { %462 = vmatprep.mubr.msk.f32.mxu0 %vm583_vm0, %v582_v0  ;;  %467 = vmatpush3.bf16.msra.mxu1 %v466_v8  ;;  %v475_v15 = vpack.c.bf16 %v38_v14, %v37_v13  ;;  %v478_v18 = vpack.c.bf16 %v40_v17, %v39_v16  ;;  %v41_v19 = vld [vmem:[#allocation2 + $0x58] sm:$0xff]  ;;  %v42_v20 = vld [vmem:[#allocation2 + $0x60] sm:$0xff]  ;;  %v43_v22 = vld [vmem:[#allocation2 + $0x68] sm:$0xff] }
  0x19   :  { %468 = vmatprep.subr.bf16.mxu1 %v584_v1  ;;  %v481_v21 = vpack.c.bf16 %v42_v20, %v41_v19  ;;  %v44_v23 = vld [vmem:[#allocation2 + $0x70] sm:$0xff]  ;;  %v45_v25 = vld [vmem:[#allocation2 + $0x78] sm:$0xff]  ;;  %v46_v26 = vld [vmem:[#allocation2 + $0x80] sm:$0xff] }
  0x1a   :  { %v484_v24 = vpack.c.bf16 %v44_v23, %v43_v22  ;;  %v487_v27 = vpack.c.bf16 %v46_v26, %v45_v25  ;;  %v47_v28 = vld [vmem:[#allocation2 + $0x88] sm:$0xff]  ;;  %v48_v29 = vld [vmem:[#allocation2 + $0x90] sm:$0xff]  ;;  %v49_v30 = vld [vmem:[#allocation2 + $0x98] sm:$0xff] }
  0x1b   :  { %v490_v31 = vpack.c.bf16 %v48_v29, %v47_v28  ;;  %v50_v32 = vld [vmem:[#allocation2 + $0xa0] sm:$0xff]  ;;  %v51_v34 = vld [vmem:[#allocation2 + $0xa8] sm:$0xff]  ;;  %v52_v35 = vld [vmem:[#allocation2 + $0xb0] sm:$0xff] }
  0x1c   :  { %470 = vmatpush3.bf16.msra.mxu1 %v469_v9  ;;  %v493_v33 = vpack.c.bf16 %v50_v32, %v49_v30  ;;  %v496_v36 = vpack.c.bf16 %v52_v35, %v51_v34  ;;  %v53_v37 = vld [vmem:[#allocation2 + $0xb8] sm:$0xff]  ;;  %v54_v38 = vld [vmem:[#allocation2 + $0xc0] sm:$0xff]  ;;  %v55_v40 = vld [vmem:[#allocation2 + $0xc8] sm:$0xff] }
  0x1d   :  { %471 = vmatprep.subr.bf16.mxu1 %v584_v1  ;;  %491 = vmatpush3.bf16.msra.mxu0 %v490_v31  ;;  %v499_v39 = vpack.c.bf16 %v54_v38, %v53_v37  ;;  %v56_v41 = vld [vmem:[#allocation2 + $0xd0] sm:$0xff]  ;;  %v57_v48 = vld [vmem:[#allocation2 + $0xd8] sm:$0xff]  ;;  %v58_v49 = vld [vmem:[#allocation2 + $0xe0] sm:$0xff] }
  0x1e   :  { %492 = vmatprep.subr.bf16.mxu0 %v584_v1  ;;  %v502_v42 = vpack.c.bf16 %v56_v41, %v55_v40  ;;  %v349_v43 = vld [vmem:[%s668_s2] ss:$0 sm:$0xff]  ;;  %v505_v50 = vpack.c.bf16 %v58_v49, %v57_v48  ;;  %v59_v51 = vld [vmem:[#allocation2 + $0xe8] sm:$0xff]  ;;  %v61_v54 = vld [vmem:[#allocation2 + $0xf8] sm:$0xff] }
  0x1f   :  { %v60_v52 = vld [vmem:[#allocation2 + $0xf0] sm:$0xff]  ;;  %v62_v55 = vld [vmem:[#allocation2 + $0x100] sm:$0xff] }
  0x20   :  { %473 = vmatpush3.bf16.msra.mxu1 %v472_v12  ;;  %v508_v53 = vpack.c.bf16 %v60_v52, %v59_v51  ;;  %v511_v56 = vpack.c.bf16 %v62_v55, %v61_v54  ;;  %v352_v57 = vld [vmem:[%s668_s2 + $0x1] ss:$0 sm:$0xff]  ;;  %v353_v62 = vld [vmem:[%s668_s2 + $0x2] ss:$0 sm:$0xff]  ;;  %s586_s2 = smov [#allocation5]  }
  0x21   :  { %474 = vmatprep.subr.bf16.mxu1 %v584_v1  ;;  %494 = vmatpush3.bf16.msra.mxu0 %v493_v33  ;;  %s340_s6 = sshll.u32 %s586_s2, 4  ;;  %s341_s6 = int_to_ptr.vmem [resolvable:$true] %s340_s6 }
  0x22   :  { %495 = vmatprep.subr.bf16.mxu0 %v584_v1  ;;  %s553_s7 = scalar_lea.vmem %s341_s6, 128  ;;  %p558_p9 = scmp.lt.s32.totalorder %s341_s6, %s341_s6 }
  0x23   :  { %p554_p8 = scmp.ne.s32.totalorder %s341_s6, %s553_s7  ;;  %p559_p10 = scmp.lt.s32.totalorder %s553_s7, %s553_s7 }
  0x24   :  { %476 = vmatpush3.bf16.msra.mxu1 %v475_v15 }
  0x25   :  { %477 = vmatprep.subr.bf16.mxu1 %v584_v1  ;;  %497 = vmatpush3.bf16.msra.mxu0 %v496_v36  ;;  %p560_p11 = por %p559_p10, %p558_p9 }
  0x26   :  { %498 = vmatprep.subr.bf16.mxu0 %v584_v1 }
  0x27   :  { %p561_p12 = pnand %p560_p11, %p554_p8 }
  0x28   :  { %479 = vmatpush3.bf16.msra.mxu1 %v478_v18 }
  0x29   :  { %480 = vmatprep.subr.bf16.mxu1 %v584_v1  ;;  %500 = vmatpush3.bf16.msra.mxu0 %v499_v39 }
  0x2a   :  { %501 = vmatprep.subr.bf16.mxu0 %v584_v1 }
  0x2c   :  { %482 = vmatpush3.bf16.msra.mxu1 %v481_v21 }
  0x2d   :  { %483 = vmatprep.subr.bf16.mxu1 %v584_v1  ;;  %503 = vmatpush3.bf16.msra.mxu0 %v502_v42 }
  0x2e   :  { %504 = vmatprep.subr.bf16.mxu0 %v584_v1 }
  0x30   :  { %485 = vmatpush3.bf16.msra.mxu1 %v484_v24 }
  0x31   :  { %486 = vmatprep.subr.bf16.mxu1 %v584_v1  ;;  %506 = vmatpush3.bf16.msra.mxu0 %v505_v50 }
  0x32   :  { %507 = vmatprep.subr.bf16.mxu0 %v584_v1 }
  0x34   :  { %488 = vmatpush3.bf16.msra.mxu1 %v487_v27 }
  0x35   :  { %509 = vmatpush3.bf16.msra.mxu0 %v508_v53 }
  0x36   :  { %510 = vmatprep.subr.bf16.mxu0 %v584_v1 }
  0x39   :  { %512 = vmatpush3.bf16.msra.mxu0 %v511_v56 }
  0xea   :  { %v144_v44 = vpop.f32.mrb[0].mxu0 }
  0xeb   :  { %v145_v45 = vadd.f32 %v349_v43, %v144_v44  ;;  %v394_v46 = vpop.f32.mrb[1].mxu0 }
  0xed   :  { %521 = vtanh.f32 %v145_v45 }
  0xf7   :  { %v522_v47 = vpop.eup %521 }
  0xf8   :  { %428 = vmatmul.mubr.f32.vlgmr.msra.gmra.mrb[0].mxu1 %v522_v47 }
 0x1cb   :  { %v219_v58 = vpop.f32.mrb[0].mxu1 }
 0x1cc   :  { %v220_v59 = vadd.f32 %v352_v57, %v219_v58  ;;  %v429_v60 = vpop.f32.mrb[1].mxu1 }
 0x1ce   :  { %523 = vtanh.f32 %v220_v59 }
 0x1d8   :  { %v524_v61 = vpop.eup %523 }
 0x1d9   :  { %463 = vmatmul.mubr.f32.vlgmr.msra.gmra.mrb[2].mxu0 %v524_v61 }
 0x2ac   :  { %v294_v63 = vpop.f32.mrb[2].mxu0 }
 0x2ad   :  { %v295_v0 = vadd.f32 %v353_v62, %v294_v63  ;;  %v464_v2 = vpop.f32.mrb[3].mxu0 }
 0x2af   :  { %v299_v1 = vsel %vm298_vm3, %v295_v0, -inf }
 0x2b0   :  { %300 = vmax.xlane.f32.xlu0 %v299_v1 }
 0x33d   :  { %v301_v3 = vpop.xlane.xlu0 %300 }
 0x33e   :  { %v302_v4 = vsub.f32 %v295_v0, %v301_v3 }
 0x340   :  { %v303_v5 = vmul.f32 1.442695, %v302_v4 }
 0x342   :  { %525 = vpow2.f32 %v303_v5 }
 0x34c   :  { %v526_v6 = vpop.eup %525 }
 0x34d   :  { %v305_v7 = vsel %vm298_vm3, %v526_v6, 0.0 }
 0x34e   :  { %306 = vadd.xlane.f32.xlu0 %v305_v7 }
 0x364   :  { %327 = vrot.lane.b32.xlu0 %v295_v0, %s585_s5 }
 0x3db   :  { %v307_v8 = vpop.xlane.xlu0 %306 }
 0x3dc   :  { %527 = vrcp.f32 %v307_v8 }
 0x3dd   :  { %529 = vlog2.f32 %v307_v8 }
 0x3df   :  { %v328_v18 = vpop.permute.xlu0 %327 }
 0x3e6   :  { %v528_v9 = vpop.eup %527 }
 0x3e7   :  { %v530_v10 = vpop.eup %529  ;;  %v309_v11 = vmul.f32 %v528_v9, %v526_v6 }
 0x3e8   :  { %v311_v12 = vmul.f32 0.6931472, %v530_v10 }
 0x3e9   :  { %319 = vst.msk [vmem:[#allocation5] sm:$0xff] %vm298_vm3, %v309_v11 }
 0x3ea   :  { %v312_v13 = vsub.f32 %v302_v4, %v311_v12 }
 0x3ec   :  { %v313_v14 = vmul.f32 %v312_v13, %v309_v11 }
 0x3ee   :  { %v314_v15 = vsel %vm298_vm3, %v313_v14, 0.0 }
 0x3ef   :  { %315 = vadd.xlane.f32.xlu1 %v314_v15 }
 0x400   :  { %321 = vrot.lane.b32.xlu1 %v312_v13, %s585_s5 }
 0x47c   :  { %v316_v16 = vpop.xlane.xlu1 %315 }
 0x47d   :  { %v317_v19 = vsub.f32 0.0, %v316_v16 }
 0x480   :  { %v322_v17 = vpop.permute.xlu1 %321 }
 0x481   :  { %325 = vst.msk [vmem:[#allocation5] sm:$0xff] %vm324_vm4, %v322_v17 }
 0x482   :  { %331 = vst.msk [vmem:[#allocation5] sm:$0xff] %vm330_vm5, %v328_v18 }
 0x483   :  { %333 = vst.msk [vmem:[#allocation5] sm:$0xff] %vm332_vm6, %v317_v19 }
 0x484   :  { %564 = shalt.err (!%p561_p12)
}
 0x485   :  { %s565_s10 = scalar_lea.hbm %s669_s3, 128 }
 0x486   :  { %p566_p13 = scmp.ne.s32.totalorder %s669_s3, %s565_s10  ;;  %p569_p0 = scmp.lt.u32.totalorder %s565_s10, %s669_s3 }
 0x488   :  { %p571_p1 = pnand %p569_p0, %p566_p13 }
 0x48a   :  { %574 = shalt.err (!%p571_p1)
}
 0x48b   :  { %343 = dma.vmem_to_hbm [thread:$0]  %s341_s6, 128, %s669_s3, [#allocation4]  }
 0x48c   :  { %577 = dma.done.wait [#allocation4], 128  }
 0x48d   :  { %578 = vsyncadd [#allocation4], 4294967168 }
 0x48e   :  { %347 = vsyncpa [#allocation3], 1 }
 0x48f   :  { %348 = vsyncpa [#allocation4], 1 }

</bundles_post_ra>
